<compile_context>
chip_gen: v5e
topology: v5e:2x2
jax: 0.10.0
libtpu: 0.0.40
codegen_flags: <defaults>
</compile_context>

<pallas_src>
import math
from functools import partial

import jax
import jax.numpy as jnp
from jax.experimental import pallas as pl
from jax.experimental.pallas import tpu as pltpu

jax.config.update("jax_default_matmul_precision", "highest")

_VMEM_LIMIT = 32 * 1024 * 1024  # explicit scoped-VMEM budget; safe on v5e/v6e/v7x


def _pick_tile(dim, pref):
    t = dim if dim <= pref else pref
    assert dim % t == 0, f"dim {dim} must be divisible by tile {t}"
    return t


# --------------------------------------------------------------------------
# Kernel 1: generic tiled linear  y = act(x @ W + b)
# --------------------------------------------------------------------------
def _matmul_kernel(x_ref, w_ref, b_ref, o_ref, acc_ref, *, activation):
    @pl.when(pl.program_id(2) == 0)
    def _():
        acc_ref[...] = jnp.zeros_like(acc_ref)

    # Operands stay in their native dtype (bf16 feeds the MXU directly);
    # accumulation is always f32.
    acc_ref[...] += jnp.dot(x_ref[...], w_ref[...],
                            preferred_element_type=jnp.float32)

    @pl.when(pl.program_id(2) == pl.num_programs(2) - 1)
    def _():
        y = acc_ref[...] + b_ref[...].astype(jnp.float32)
        if activation == "relu":
            y = jnp.maximum(y, 0.0)
        o_ref[...] = y.astype(o_ref.dtype)


def linear(x, w, b=None, activation=None, *, tm=128, tn=128, tk=512):
    """x: [..., K]; w: [K, N] (pre-transposed torch weight); b: [N] or None."""
    *lead, K = x.shape
    N = w.shape[1]
    M = math.prod(lead)
    x2 = x.reshape(M, K)
    b2 = (jnp.zeros((1, N), jnp.float32) if b is None
          else b.reshape(1, N).astype(jnp.float32))

    tm = _pick_tile(M, tm)
    tn = _pick_tile(N, tn)
    tk = _pick_tile(K, tk)
    grid = (M // tm, N // tn, K // tk)

    out = pl.pallas_call(
        partial(_matmul_kernel, activation=activation),
        out_shape=jax.ShapeDtypeStruct((M, N), x.dtype),
        grid=grid,
        in_specs=[pl.BlockSpec((tm, tk), lambda i, j, k: (i, k)),
                  pl.BlockSpec((tk, tn), lambda i, j, k: (k, j)),
                  pl.BlockSpec((1, tn), lambda i, j, k: (0, j))],
        out_specs=pl.BlockSpec((tm, tn), lambda i, j, k: (i, j)),
        scratch_shapes=[pltpu.VMEM((tm, tn), jnp.float32)],
        compiler_params=pltpu.CompilerParams(
            dimension_semantics=("parallel", "parallel", "arbitrary"),
            vmem_limit_bytes=_VMEM_LIMIT),
    )(x2, w, b2)
    return out.reshape(*lead, N)


# --------------------------------------------------------------------------
# Kernel 2: flash attention (online softmax, grid over batch/head/q-tile/kv-tile)
# --------------------------------------------------------------------------
def _flash_kernel(q_ref, k_ref, v_ref, mask_ref, o_ref, m_sc, l_sc, acc_sc, *, scale):
    ki = pl.program_id(3)

    @pl.when(ki == 0)
    def _():
        m_sc[...] = jnp.full_like(m_sc, -jnp.inf)
        l_sc[...] = jnp.zeros_like(l_sc)
        acc_sc[...] = jnp.zeros_like(acc_sc)

    q = q_ref[0, 0] * scale          # fold 1/sqrt(d_head) into the small q tile
    k = k_ref[0, 0]
    v = v_ref[0, 0]

    # QK^T contracting d_head directly -> no explicit transpose / relayout of K
    s = jax.lax.dot_general(q, k, (((1,), (1,)), ((), ())),
                            preferred_element_type=jnp.float32)     # (tq, tk)
    # Additive mask: one (tq, tk) tile per batch, shared across heads.
    s = s + mask_ref[0].astype(jnp.float32)

    m_prev = m_sc[...]
    m_new = jnp.maximum(m_prev, jnp.max(s, axis=-1, keepdims=True))
    alpha = jnp.exp(m_prev - m_new)
    p = jnp.exp(s - m_new)
    l_sc[...] = alpha * l_sc[...] + jnp.sum(p, axis=-1, keepdims=True)
    acc_sc[...] = alpha * acc_sc[...] + jax.lax.dot_general(
        p.astype(v.dtype), v, (((1,), (0,)), ((), ())),
        preferred_element_type=jnp.float32)
    m_sc[...] = m_new

    @pl.when(ki == pl.num_programs(3) - 1)
    def _():
        o_ref[0, 0] = (acc_sc[...] *
                       pl.reciprocal(l_sc[...], approx=True)).astype(o_ref.dtype)


def flash_attention(q, k, v, mask, *, sm_scale, block_q=128, block_kv=128):
    """q: [B,H,Sq,dh]; k,v: [B,H,Skv,dh]; mask: [B,Sq,Skv] additive (f32)."""
    B, H, Sq, dh = q.shape
    Skv = k.shape[2]
    tq = _pick_tile(Sq, block_q)
    tk = _pick_tile(Skv, block_kv)
    grid = (B, H, Sq // tq, Skv // tk)

    return pl.pallas_call(
        partial(_flash_kernel, scale=sm_scale),
        out_shape=jax.ShapeDtypeStruct((B, H, Sq, dh), q.dtype),
        grid=grid,
        in_specs=[
            pl.BlockSpec((1, 1, tq, dh), lambda b, h, qi, ki: (b, h, qi, 0)),
            pl.BlockSpec((1, 1, tk, dh), lambda b, h, qi, ki: (b, h, ki, 0)),
            pl.BlockSpec((1, 1, tk, dh), lambda b, h, qi, ki: (b, h, ki, 0)),
            # mask has NO head dim -> index_map ignores h (broadcast over heads)
            pl.BlockSpec((1, tq, tk), lambda b, h, qi, ki: (b, qi, ki)),
        ],
        out_specs=pl.BlockSpec((1, 1, tq, dh), lambda b, h, qi, ki: (b, h, qi, 0)),
        scratch_shapes=[pltpu.VMEM((tq, 1), jnp.float32),   # m (running max)
                        pltpu.VMEM((tq, 1), jnp.float32),   # l (running denom)
                        pltpu.VMEM((tq, dh), jnp.float32)], # acc
        compiler_params=pltpu.CompilerParams(
            dimension_semantics=("parallel", "parallel", "parallel", "arbitrary"),
            vmem_limit_bytes=_VMEM_LIMIT),
    )(q, k, v, mask)


# --------------------------------------------------------------------------
# Kernel 3: fused residual add + LayerNorm over d_model
# --------------------------------------------------------------------------
def _add_ln_kernel(x_ref, r_ref, g_ref, b_ref, o_ref, *, eps):
    x = x_ref[...].astype(jnp.float32) + r_ref[...].astype(jnp.float32)
    mu = jnp.mean(x, axis=-1, keepdims=True)
    xc = x - mu
    var = jnp.mean(xc * xc, axis=-1, keepdims=True)
    y = xc * jax.lax.rsqrt(var + eps)
    y = y * g_ref[...].astype(jnp.float32) + b_ref[...].astype(jnp.float32)
    o_ref[...] = y.astype(o_ref.dtype)


def add_layernorm(x, res, gamma, beta, *, eps=1e-5, tm=256):
    B, S, D = x.shape
    M = B * S
    tm = _pick_tile(M, tm)
    out = pl.pallas_call(
        partial(_add_ln_kernel, eps=eps),
        out_shape=jax.ShapeDtypeStruct((M, D), x.dtype),
        grid=(M // tm,),
        in_specs=[pl.BlockSpec((tm, D), lambda i: (i, 0)),
                  pl.BlockSpec((tm, D), lambda i: (i, 0)),
                  pl.BlockSpec((1, D), lambda i: (0, 0)),
                  pl.BlockSpec((1, D), lambda i: (0, 0))],
        out_specs=pl.BlockSpec((tm, D), lambda i: (i, 0)),
        compiler_params=pltpu.CompilerParams(
            dimension_semantics=("parallel",),
            vmem_limit_bytes=_VMEM_LIMIT),
    )(x.reshape(M, D), res.reshape(M, D), gamma.reshape(1, D), beta.reshape(1, D))
    return out.reshape(B, S, D)


# --------------------------------------------------------------------------
# Module-level wrappers
# --------------------------------------------------------------------------
def multi_head_attention(xq, xk, xv, mask, wq, wk, wv, wo, *, n_heads,
                         block_q=128, block_kv=128):
    """xq: [B,Sq,D]; xk/xv: [B,Skv,D]; mask: [B,Sq,Skv] additive; w*: [D,D] pre-transposed."""
    B, Sq, D = xq.shape
    Skv = xk.shape[1]
    dh = D // n_heads

    q = linear(xq, wq)
    k = linear(xk, wk)
    v = linear(xv, wv)

    # split heads (wrapper-side relayout, same as torch .view().transpose(1,2))
    q = q.reshape(B, Sq, n_heads, dh).transpose(0, 2, 1, 3)
    k = k.reshape(B, Skv, n_heads, dh).transpose(0, 2, 1, 3)
    v = v.reshape(B, Skv, n_heads, dh).transpose(0, 2, 1, 3)

    ctx = flash_attention(q, k, v, mask, sm_scale=1.0 / math.sqrt(dh),
                          block_q=block_q, block_kv=block_kv)
    ctx = ctx.transpose(0, 2, 1, 3).reshape(B, Sq, D)   # merge heads
    return linear(ctx, wo)


def decoder_layer(dec_inputs, enc_outputs, dec_self_attn_mask, dec_enc_attn_mask,
                  p, *, n_heads, block_q=128, block_kv=128):
    # --- masked self attention + residual + LN1 ---
    sa = multi_head_attention(dec_inputs, dec_inputs, dec_inputs, dec_self_attn_mask,
                              p["wq1"], p["wk1"], p["wv1"], p["wo1"],
                              n_heads=n_heads, block_q=block_q, block_kv=block_kv)
    out1 = add_layernorm(sa, dec_inputs, p["g1"], p["b1"])
    # --- encoder-decoder cross attention + residual + LN2 ---
    ca = multi_head_attention(out1, enc_outputs, enc_outputs, dec_enc_attn_mask,
                              p["wq2"], p["wk2"], p["wv2"], p["wo2"],
                              n_heads=n_heads, block_q=block_q, block_kv=block_kv)
    out2 = add_layernorm(ca, out1, p["g2"], p["b2"])
    # --- position-wise FFN + residual + LN3 ---
    h = linear(out2, p["w_ff1"], p["b_ff1"], activation="relu")
    ff = linear(h, p["w_ff2"], p["b_ff2"])
    # TODO(synk): nn.Dropout is identity at inference; training-mode RNG dropout not implemented.
    return add_layernorm(ff, out2, p["g3"], p["b3"])


# --------------------------------------------------------------------------
# Pure-JAX reference (mirrors the PyTorch module; weights in torch (out,in) layout)
# --------------------------------------------------------------------------
def decoder_layer_reference(dec_inputs, enc_outputs, self_mask, enc_mask, tp, *, n_heads):
    D = dec_inputs.shape[-1]
    dh = D // n_heads

    def proj(x, w):  # torch Linear (bias=False): y = x @ W^T
        return jnp.einsum("bsd,od->bso", x, w)

    def mha(xq, xk, xv, mask, wq, wk, wv, wo):
        B, Sq, _ = xq.shape
        Skv = xk.shape[1]

        def split(x, S):
            return x.reshape(B, S, n_heads, dh).transpose(0, 2, 1, 3)

        Q, K, V = split(proj(xq, wq), Sq), split(proj(xk, wk), Skv), split(proj(xv, wv), Skv)
        scores = jnp.einsum("bhqd,bhkd->bhqk", Q, K) / jnp.sqrt(jnp.float32(dh))
        scores = scores + mask[:, None, :, :]     # per-batch mask broadcast over heads
        attn = jax.nn.softmax(scores, axis=-1)
        ctx = jnp.einsum("bhqk,bhkd->bhqd", attn, V)
        ctx = ctx.transpose(0, 2, 1, 3).reshape(B, Sq, D)
        return proj(ctx, wo)

    def ln(x, g, b, eps=1e-5):
        mu = jnp.mean(x, axis=-1, keepdims=True)
        var = jnp.mean((x - mu) ** 2, axis=-1, keepdims=True)
        return (x - mu) / jnp.sqrt(var + eps) * g + b

    sa = mha(dec_inputs, dec_inputs, dec_inputs, self_mask,
             tp["wq1"], tp["wk1"], tp["wv1"], tp["wo1"])
    out1 = ln(sa + dec_inputs, tp["g1"], tp["b1"])
    ca = mha(out1, enc_outputs, enc_outputs, enc_mask,
             tp["wq2"], tp["wk2"], tp["wv2"], tp["wo2"])
    out2 = ln(ca + out1, tp["g2"], tp["b2"])
    h = jnp.maximum(jnp.einsum("bsd,fd->bsf", out2, tp["w_ff1"]) + tp["b_ff1"], 0.0)
    ff = jnp.einsum("bsf,df->bsd", h, tp["w_ff2"]) + tp["b_ff2"]
    return ln(ff + out2, tp["g3"], tp["b3"])


# --------------------------------------------------------------------------
if __name__ == "__main__":
    B, TGT, SRC = 2, 16, 16
    D_MODEL, N_HEADS, D_FF = 32, 4, 64

    key = jax.random.PRNGKey(0)
    (k_dec, k_enc,
     k_wq1, k_wk1, k_wv1, k_wo1, k_wq2, k_wk2, k_wv2, k_wo2,
     k_wf1, k_wf2, k_bf1, k_bf2,
     k_g1, k_b1, k_g2, k_b2, k_g3, k_b3) = jax.random.split(key, 20)

    dec_inputs = jax.random.normal(k_dec, (B, TGT, D_MODEL), dtype=jnp.float32)
    enc_outputs = jax.random.normal(k_enc, (B, SRC, D_MODEL), dtype=jnp.float32)

    # torch-layout weights: (out_features, in_features)
    def w(k, shape, scale=0.05):
        return scale * jax.random.normal(k, shape, dtype=jnp.float32)

    torch_params = dict(
        wq1=w(k_wq1, (D_MODEL, D_MODEL)), wk1=w(k_wk1, (D_MODEL, D_MODEL)),
        wv1=w(k_wv1, (D_MODEL, D_MODEL)), wo1=w(k_wo1, (D_MODEL, D_MODEL)),
        wq2=w(k_wq2, (D_MODEL, D_MODEL)), wk2=w(k_wk2, (D_MODEL, D_MODEL)),
        wv2=w(k_wv2, (D_MODEL, D_MODEL)), wo2=w(k_wo2, (D_MODEL, D_MODEL)),
        w_ff1=w(k_wf1, (D_FF, D_MODEL), 0.1), b_ff1=w(k_bf1, (D_FF,), 0.1),
        w_ff2=w(k_wf2, (D_MODEL, D_FF), 0.1), b_ff2=w(k_bf2, (D_MODEL,), 0.1),
        g1=1.0 + 0.1 * jax.random.normal(k_g1, (D_MODEL,), dtype=jnp.float32),
        b1=0.1 * jax.random.normal(k_b1, (D_MODEL,), dtype=jnp.float32),
        g2=1.0 + 0.1 * jax.random.normal(k_g2, (D_MODEL,), dtype=jnp.float32),
        b2=0.1 * jax.random.normal(k_b2, (D_MODEL,), dtype=jnp.float32),
        g3=1.0 + 0.1 * jax.random.normal(k_g3, (D_MODEL,), dtype=jnp.float32),
        b3=0.1 * jax.random.normal(k_b3, (D_MODEL,), dtype=jnp.float32),
    )
    # Pallas path takes projection / FFN weights pre-transposed to [d_in, d_out]
    pallas_params = dict(torch_params)
    for name in ("wq1", "wk1", "wv1", "wo1", "wq2", "wk2", "wv2", "wo2",
                 "w_ff1", "w_ff2"):
        pallas_params[name] = torch_params[name].T

    # additive masks (no head dimension; broadcast over heads inside the kernel)
    causal = jnp.where(jnp.tril(jnp.ones((TGT, TGT), dtype=bool)), 0.0, -1e9)
    dec_self_attn_mask = jnp.broadcast_to(causal.astype(jnp.float32), (B, TGT, TGT))
    # cross-attn padding mask: batch 0 masks the last 4 source positions, batch 1 none
    src_valid = jnp.array([[1] * 12 + [0] * 4, [1] * 16], dtype=jnp.float32)  # [B, SRC]
    dec_enc_attn_mask = jnp.broadcast_to(
        jnp.where(src_valid[:, None, :] > 0, 0.0, -1e9).astype(jnp.float32),
        (B, TGT, SRC))

    # block_q/block_kv = 8 at these tiny shapes so the online-softmax multi-tile
    # path is actually exercised; at real shapes they default to 128.
    out = decoder_layer(dec_inputs, enc_outputs, dec_self_attn_mask, dec_enc_attn_mask,
                        pallas_params, n_heads=N_HEADS, block_q=8, block_kv=8)
    out = jax.block_until_ready(out)

    ref = decoder_layer_reference(dec_inputs, enc_outputs, dec_self_attn_mask,
                                  dec_enc_attn_mask, torch_params, n_heads=N_HEADS)

    assert out.shape == (B, TGT, D_MODEL)
    assert jnp.allclose(out, ref, atol=2e-2, rtol=2e-2), (
        f"max abs err {jnp.max(jnp.abs(out - ref))}")

    print("KERNEL_OK")
</pallas_src>

<mosaic_0001>
module attributes {stable_mosaic.version = 11 : i64} {
  func.func @_matmul_kernel(%arg0: i32, %arg1: i32, %arg2: i32, %arg3: memref<32x32xf32, #tpu.memory_space<vmem>>, %arg4: memref<32x32xf32, #tpu.memory_space<vmem>>, %arg5: memref<1x32xf32, #tpu.memory_space<vmem>>, %arg6: memref<32x32xf32, #tpu.memory_space<vmem>>, %arg7: memref<32x32xf32, #tpu.memory_space<vmem>>) attributes {dimension_semantics = [#tpu.dimension_semantics<parallel>, #tpu.dimension_semantics<parallel>, #tpu.dimension_semantics<arbitrary>], iteration_bounds = array<i64: 1, 1, 1>, scalar_prefetch = 0 : i64, scratch_operands = 1 : i64, tpu.core_type = #tpu.core_type<tc>, window_params = [{transform_indices = @transform_0, window_bounds = array<i64: 32, 32>}, {transform_indices = @transform_1, window_bounds = array<i64: 32, 32>}, {transform_indices = @transform_2, window_bounds = array<i64: 1, 32>}, {transform_indices = @transform_3, window_bounds = array<i64: 32, 32>}]} {
    %c0_i32 = arith.constant 0 : i32
    %0 = arith.cmpi eq, %arg2, %c0_i32 : i32
    %1 = arith.extui %0 : i1 to i32
    %c0_i32_0 = arith.constant 0 : i32
    %2 = arith.cmpi ne, %1, %c0_i32_0 : i32
    scf.if %2 {
      %cst_10 = arith.constant 0.000000e+00 : f32
      %12 = vector.broadcast %cst_10 : f32 to vector<32x32xf32>
      %c0_11 = arith.constant 0 : index
      %c0_12 = arith.constant 0 : index
      %13 = vector.load %arg7[%c0_11, %c0_12] : memref<32x32xf32, #tpu.memory_space<vmem>>, vector<32x32xf32>
      tpu.vector_store %arg7[%c0_11, %c0_12], %12 {strides = array<i32>} : memref<32x32xf32, #tpu.memory_space<vmem>>, vector<32x32xf32>,
    } else {
    }
    %c0 = arith.constant 0 : index
    %c0_1 = arith.constant 0 : index
    %3 = vector.load %arg7[%c0, %c0_1] : memref<32x32xf32, #tpu.memory_space<vmem>>, vector<32x32xf32>
    %c0_2 = arith.constant 0 : index
    %c0_3 = arith.constant 0 : index
    %4 = vector.load %arg3[%c0_2, %c0_3] : memref<32x32xf32, #tpu.memory_space<vmem>>, vector<32x32xf32>
    %c0_4 = arith.constant 0 : index
    %c0_5 = arith.constant 0 : index
    %5 = vector.load %arg4[%c0_4, %c0_5] : memref<32x32xf32, #tpu.memory_space<vmem>>, vector<32x32xf32>
    %cst = arith.constant dense<0.000000e+00> : vector<32x32xf32>
    %6 = tpu.matmul %4, %5, %cst {dimension_numbers = #tpu.dot_dimension_numbers<[1], [0], [0], [1], [0, 0, 1, 1], [], []>, precision = #tpu.contract_precision<fp32>} : vector<32x32xf32>, vector<32x32xf32>, vector<32x32xf32> -> vector<32x32xf32>
    %7 = arith.addf %3, %6 : vector<32x32xf32>
    %c0_6 = arith.constant 0 : index
    %c0_7 = arith.constant 0 : index
    %8 = vector.load %arg7[%c0_6, %c0_7] : memref<32x32xf32, #tpu.memory_space<vmem>>, vector<32x32xf32>
    tpu.vector_store %arg7[%c0_6, %c0_7], %7 {strides = array<i32>} : memref<32x32xf32, #tpu.memory_space<vmem>>, vector<32x32xf32>,
    %c0_i32_8 = arith.constant 0 : i32
    %9 = arith.cmpi eq, %arg2, %c0_i32_8 : i32
    %10 = arith.extui %9 : i1 to i32
    %c0_i32_9 = arith.constant 0 : i32
    %11 = arith.cmpi ne, %10, %c0_i32_9 : i32
    scf.if %11 {
      %c0_10 = arith.constant 0 : index
      %c0_11 = arith.constant 0 : index
      %12 = vector.load %arg7[%c0_10, %c0_11] : memref<32x32xf32, #tpu.memory_space<vmem>>, vector<32x32xf32>
      %c0_12 = arith.constant 0 : index
      %c0_13 = arith.constant 0 : index
      %13 = vector.load %arg5[%c0_12, %c0_13] : memref<1x32xf32, #tpu.memory_space<vmem>>, vector<1x32xf32>
      %14 = vector.broadcast %13 : vector<1x32xf32> to vector<32x32xf32>
      %15 = arith.addf %12, %14 : vector<32x32xf32>
      %c0_14 = arith.constant 0 : index
      %c0_15 = arith.constant 0 : index
      %16 = vector.load %arg6[%c0_14, %c0_15] : memref<32x32xf32, #tpu.memory_space<vmem>>, vector<32x32xf32>
      tpu.vector_store %arg6[%c0_14, %c0_15], %15 {strides = array<i32>} : memref<32x32xf32, #tpu.memory_space<vmem>>, vector<32x32xf32>,
    } else {
    }
    return
  }
  func.func @transform_0(%arg0: i32, %arg1: i32, %arg2: i32) -> (i32, i32) {
    %c0_i32 = arith.constant 0 : i32
    return %arg0, %arg2 : i32, i32
  }
  func.func @transform_1(%arg0: i32, %arg1: i32, %arg2: i32) -> (i32, i32) {
    %c0_i32 = arith.constant 0 : i32
    return %arg2, %arg1 : i32, i32
  }
  func.func @transform_2(%arg0: i32, %arg1: i32, %arg2: i32) -> (i32, i32) {
    %c0_i32 = arith.constant 0 : i32
    %c0_i32_0 = arith.constant 0 : i32
    return %c0_i32, %arg1 : i32, i32
  }
  func.func @transform_3(%arg0: i32, %arg1: i32, %arg2: i32) -> (i32, i32) {
    %c0_i32 = arith.constant 0 : i32
    return %arg0, %arg1 : i32, i32
  }
}

</mosaic_0001>

<bundles_post_ra>
// kernel: tpu_custom_call.1
= control target key start
LH: loop header
LB: loop body
LE: loop exit
PB: predicated region body
PF: predicated region fallthrough
CT: control target
= control target key end

     0   :  { %8 = vsyncpa [#allocation4], 0  ;;  %s622_s0 = inlined_call_operand.hbm [shape: f32[32,32], index: 0, kind: input, shape index: {}]   ;;  %s623_s1 = inlined_call_operand.hbm [shape: f32[32,32], index: 1, kind: input, shape index: {}]   ;;  %s624_s2 = inlined_call_operand.vmem [shape: f32[1,32], index: 2, kind: input, shape index: {}]   ;;  %s625_s3 = inlined_call_operand.hbm [shape: f32[32,32], index: 3, kind: output, shape index: {}]  }
   0x1   :  { %9 = vsyncpa [#allocation7], 0 }
   0x2   :  { %10 = vsyncpa [#allocation5], 0  ;;  %s15_s14 = sshll.u32 %s622_s0, 4  ;;  %s499_s15 = smov [#allocation3]   ;;  %s16_s14 = int_to_ptr.hbm [resolvable:$true] %s15_s14 }
   0x3   :  { %s17_s16 = sshll.u32 %s499_s15, 4  ;;  %s28_s19 = sshll.u32 %s623_s1, 4  ;;  %s18_s16 = int_to_ptr.vmem [resolvable:$true] %s17_s16  ;;  %s29_s19 = int_to_ptr.hbm [resolvable:$true] %s28_s19 }
   0x4   :  { %s500_s20 = smov 128   ;;  %s501_s21 = smov 8  }
   0x5   :  { %23 = dma.hbm_to_vmem [thread:$0]  %s16_s14, 512, %s18_s16, [#allocation4], %s500_s20, %s500_s20, %s501_s21  }
   0x6   :  { %s502_s22 = smov [#allocation6]  }
   0x7   :  { %s30_s23 = sshll.u32 %s502_s22, 4  ;;  %s31_s23 = int_to_ptr.vmem [resolvable:$true] %s30_s23 }
   0x8   :  { %36 = dma.hbm_to_vmem [thread:$0]  %s29_s19, 512, %s31_s23, [#allocation7], %s500_s20, %s500_s20, %s501_s21  }
   0x9   :  { %493 = dma.done.wait [#allocation4], 512  }
   0xa   :  { %494 = vsyncadd [#allocation4], 4294966784 }
   0xb   :  { %495 = dma.done.wait [#allocation7], 512  }
   0xc   :  { %496 = vsyncadd [#allocation7], 4294966784  ;;  %vm51_vm0 = vcmask 261120   ;;  %v67_v0 = vld [vmem:[#allocation6 + $0x18] sm:$0xff]  ;;  %v66_v1 = vld [vmem:[#allocation6 + $0x10] sm:$0xff]  ;;  %v503_v52 = vmov 0.0  }
   0xd   :  { %v65_v2 = vld [vmem:[#allocation6 + $0x8] sm:$0xff]  ;;  %v537_v3 = vand.u32 4294901760, %v67_v0  ;;  %v539_v4 = vand.u32 4294901760, %v66_v1  ;;  %v64_v6 = vld [vmem:[#allocation6] sm:$0xff]  ;;  %v62_v7 = vld [vmem:[#allocation3 + $0x10] sm:$0xff]  ;;  %52 = vst.msk [vmem:[#allocation2] sm:$0xff] %vm51_vm0, %v503_v52 }
   0xe   :  { %v541_v5 = vand.u32 4294901760, %v65_v2  ;;  %v63_v8 = vld [vmem:[#allocation3 + $0x18] sm:$0xff]  ;;  %v543_v9 = vand.u32 4294901760, %v64_v6  ;;  %v76_v10 = vsel %vm51_vm0, %v62_v7, 0  ;;  %v60_v12 = vld [vmem:[#allocation3] sm:$0xff]  ;;  %v61_v13 = vld [vmem:[#allocation3 + $0x8] sm:$0xff] }
   0xf   :  { %v79_v11 = vsel %vm51_vm0, %v63_v8, 0  ;;  %406 = vmatpush.msra.mxu2 %v537_v3  ;;  %v147_v14 = vsub.f32 %v67_v0, %v537_v3  ;;  %v549_v15 = vand.u32 4294901760, %v76_v10  ;;  %v153_v16 = vsub.f32 %v66_v1, %v539_v4  ;;  %94 = vmatpush.msra.mxu0 %v537_v3  ;;  %53 = vst.msk [vmem:[#allocation2 + $0x8] sm:$0xff] %vm51_vm0, %v503_v52  ;;  %s392_s27 = sshll.u32 %s625_s3, 4  ;;  %s393_s27 = int_to_ptr.hbm [resolvable:$true] %s392_s27 }
  0x10   :  { %v159_v17 = vsub.f32 %v65_v2, %v541_v5  ;;  %v165_v18 = vsub.f32 %v64_v6, %v543_v9  ;;  %v555_v19 = vand.u32 4294901760, %v79_v11  ;;  %v70_v20 = vsel %vm51_vm0, %v60_v12, 0  ;;  %54 = vst.msk [vmem:[#allocation2 + $0x10] sm:$0xff] %vm51_vm0, %v503_v52 }
  0x11   :  { %v73_v21 = vsel %vm51_vm0, %v61_v13, 0  ;;  %407 = vmatpush.msra.mxu2 %v539_v4  ;;  %v148_v22 = vand.u32 4294901760, %v147_v14  ;;  %v561_v23 = vsub.f32 %v76_v10, %v549_v15  ;;  %v154_v24 = vand.u32 4294901760, %v153_v16  ;;  %96 = vmatpush.msra.mxu0 %v539_v4  ;;  %55 = vst.msk [vmem:[#allocation2 + $0x18] sm:$0xff] %vm51_vm0, %v503_v52 }
  0x12   :  { %v160_v25 = vand.u32 4294901760, %v159_v17  ;;  %v166_v26 = vand.u32 4294901760, %v165_v18  ;;  %v565_v27 = vsub.f32 %v79_v11, %v555_v19  ;;  %v101_v28 = vand.u32 4294901760, %v70_v20 }
  0x13   :  { %v567_v29 = vand.u32 4294901760, %v73_v21  ;;  %408 = vmatpush.msra.mxu2 %v541_v5  ;;  %v149_v30 = vsub.f32 %v147_v14, %v148_v22  ;;  %v119_v31 = vand.u32 4294901760, %v561_v23  ;;  %v155_v32 = vsub.f32 %v153_v16, %v154_v24  ;;  %98 = vmatpush.msra.mxu0 %v541_v5 }
  0x14   :  { %v161_v33 = vsub.f32 %v159_v17, %v160_v25  ;;  %v167_v34 = vsub.f32 %v165_v18, %v166_v26  ;;  %v102_v35 = vsub.f32 %v70_v20, %v101_v28  ;;  %v127_v40 = vand.u32 4294901760, %v565_v27  ;;  %v56_v6 = vld [vmem:[#allocation2] sm:$0xff] }
  0x15   :  { %v110_v36 = vsub.f32 %v73_v21, %v567_v29  ;;  %409 = vmatpush.msra.mxu2 %v543_v9  ;;  %v150_v37 = vand.u32 4294901760, %v149_v30  ;;  %v120_v38 = vsub.f32 %v561_v23, %v119_v31  ;;  %v156_v39 = vand.u32 4294901760, %v155_v32  ;;  %100 = vmatpush.msra.mxu0 %v543_v9  ;;  %v420_v20 = vld [vmem:[%s624_s2] ss:$0 sm:$0xff]  ;;  %s504_s2 = smov [#allocation8]  }
  0x16   :  { %v103_v41 = vand.u32 4294901760, %v102_v35  ;;  %v162_v43 = vand.u32 4294901760, %v161_v33  ;;  %v168_v46 = vand.u32 4294901760, %v167_v34  ;;  %v128_v47 = vsub.f32 %v565_v27, %v127_v40  ;;  %s390_s24 = sshll.u32 %s504_s2, 4  ;;  %s391_s24 = int_to_ptr.vmem [resolvable:$true] %s390_s24 }
  0x17   :  { %201 = vmatpush.msrb.mxu2 %v147_v14  ;;  %292 = vmatpush.msrb.mxu0 %v148_v22  ;;  %v121_v42 = vand.u32 4294901760, %v120_v38  ;;  %v111_v45 = vand.u32 4294901760, %v110_v36 }
  0x18   :  { %410 = vmatpush.msra.mxu3 %v150_v37  ;;  %151 = vmatpush.msra.mxu1 %v150_v37  ;;  %v104_v44 = vsub.f32 %v102_v35, %v103_v41  ;;  %v129_v50 = vand.u32 4294901760, %v128_v47 }
  0x19   :  { %204 = vmatpush.msrb.mxu2 %v153_v16  ;;  %296 = vmatpush.msrb.mxu0 %v154_v24  ;;  %v112_v49 = vsub.f32 %v110_v36, %v111_v45 }
  0x1a   :  { %122 = vmatmul.f32.vlgmr.msra.gmra.mxu2 %v121_v42  ;;  %411 = vmatpush.msra.mxu3 %v156_v39  ;;  %v105_v48 = vand.u32 4294901760, %v104_v44 }
  0x1b   :  { %157 = vmatpush.msra.mxu1 %v156_v39  ;;  %207 = vmatpush.msrb.mxu2 %v159_v17  ;;  %v113_v51 = vand.u32 4294901760, %v112_v49  ;;  %v57_v17 = vld [vmem:[#allocation2 + $0x8] sm:$0xff] }
  0x1c   :  { %412 = vmatpush.msra.mxu3 %v162_v43  ;;  %300 = vmatpush.msrb.mxu0 %v160_v25 }
  0x1d   :  { %163 = vmatpush.msra.mxu1 %v162_v43  ;;  %106 = vmatmul.f32.vlgmr.msra.gmra.mxu0 %v105_v48  ;;  %v59_v43 = vld [vmem:[#allocation2 + $0x18] sm:$0xff] }
  0x1e   :  { %413 = vmatpush.msra.mxu3 %v168_v46  ;;  %210 = vmatpush.msrb.mxu2 %v165_v18 }
  0x1f   :  { %179 = vmatmul.f32.vlgmr.msra.gmra.mxu3 %v549_v15  ;;  %169 = vmatpush.msra.mxu1 %v168_v46 }
  0x20   :  { %245 = vmatpush.msrb.mxu3 %v537_v3  ;;  %171 = vmatmul.f32.vlgmr.msra.gmra.mxu1 %v101_v28 }
  0x21   :  { %335 = vmatpush.msrb.mxu1 %v537_v3  ;;  %304 = vmatpush.msrb.mxu0 %v166_v26 }
  0x22   :  { %130 = vmatmul.f32.gmra.mxu2 %v129_v50  ;;  %247 = vmatpush.msrb.mxu3 %v539_v4 }
  0x23   :  { %337 = vmatpush.msrb.mxu1 %v539_v4 }
  0x24   :  { %249 = vmatpush.msrb.mxu3 %v541_v5 }
  0x25   :  { %114 = vmatmul.f32.gmra.mxu0 %v113_v51  ;;  %339 = vmatpush.msrb.mxu1 %v541_v5 }
  0x26   :  { %251 = vmatpush.msrb.mxu3 %v543_v9 }
  0x27   :  { %183 = vmatmul.f32.gmra.mxu3 %v555_v19  ;;  %341 = vmatpush.msrb.mxu1 %v543_v9 }
  0x28   :  { %175 = vmatmul.f32.gmra.mxu1 %v567_v29 }
  0x2a   :  { %213 = vmatmul.f32.vlgmr.msrb.gmra.mxu2 %v102_v35 }
  0x2d   :  { %306 = vmatmul.f32.vlgmr.msrb.gmra.mxu0 %v101_v28 }
  0x2f   :  { %255 = vmatmul.f32.vlgmr.msrb.gmra.mxu3 %v103_v41 }
  0x30   :  { %343 = vmatmul.f32.vlgmr.msrb.gmra.mxu1 %v101_v28 }
  0x32   :  { %218 = vmatmul.f32.gmra.mxu2 %v110_v36 }
  0x35   :  { %310 = vmatmul.f32.gmra.mxu0 %v567_v29 }
  0x37   :  { %261 = vmatmul.f32.gmra.mxu3 %v111_v45 }
  0x38   :  { %347 = vmatmul.f32.gmra.mxu1 %v567_v29 }
  0x3a   :  { %223 = vmatmul.f32.gmra.mxu2 %v561_v23 }
  0x3d   :  { %314 = vmatmul.f32.gmra.mxu0 %v549_v15 }
  0x3f   :  { %267 = vmatmul.f32.gmra.mxu3 %v119_v31  ;;  %v58_v31 = vld [vmem:[#allocation2 + $0x10] sm:$0xff] }
  0x40   :  { %351 = vmatmul.f32.gmra.mxu1 %v549_v15 }
  0x42   :  { %228 = vmatmul.f32.gmra.mxu2 %v565_v27 }
  0x45   :  { %318 = vmatmul.f32.gmra.mxu0 %v555_v19 }
  0x47   :  { %273 = vmatmul.f32.gmra.mxu3 %v127_v40 }
  0x48   :  { %355 = vmatmul.f32.gmra.mxu1 %v555_v19 }
  0x9a   :  { %v107_v53 = vpop.f32.mrf.mxu0 }
  0x9d   :  { %v123_v54 = vpop.f32.mrf.mxu2  ;;  %v172_v55 = vpop.f32.mrf.mxu1 }
  0x9e   :  { %v173_v0 = vadd.f32 %v172_v55, %v107_v53 }
  0xa2   :  { %v180_v56 = vpop.f32.mrf.mxu3  ;;  %v115_v57 = vpop.f32.mrf.mxu0 }
  0xa3   :  { %v181_v18 = vadd.f32 %v180_v56, %v123_v54 }
  0xa5   :  { %v131_v58 = vpop.f32.mrf.mxu2  ;;  %v176_v59 = vpop.f32.mrf.mxu1 }
  0xa6   :  { %v177_v8 = vadd.f32 %v176_v59, %v115_v57 }
  0xaa   :  { %v184_v60 = vpop.f32.mrf.mxu3  ;;  %v307_v61 = vpop.f32.mrf.mxu0 }
  0xab   :  { %v185_v32 = vadd.f32 %v184_v60, %v131_v58 }
  0xad   :  { %v214_v62 = vpop.f32.mrf.mxu2  ;;  %v344_v63 = vpop.f32.mrf.mxu1 }
  0xae   :  { %v215_v1 = vadd.f32 %v214_v62, %v173_v0 }
  0xb2   :  { %v256_v2 = vpop.f32.mrf.mxu3  ;;  %v311_v7 = vpop.f32.mrf.mxu0 }
  0xb3   :  { %v257_v3 = vadd.f32 %v256_v2, %v215_v1 }
  0xb5   :  { %v219_v4 = vpop.f32.mrf.mxu2  ;;  %v308_v5 = vadd.f32 %v307_v61, %v257_v3  ;;  %v348_v10 = vpop.f32.mrf.mxu1 }
  0xb6   :  { %v220_v11 = vadd.f32 %v219_v4, %v177_v8 }
  0xb7   :  { %v345_v9 = vadd.f32 %v344_v63, %v308_v5 }
  0xb9   :  { %v359_v12 = vadd.f32 %v345_v9, %v56_v6 }
  0xba   :  { %v262_v13 = vpop.f32.mrf.mxu3  ;;  %v315_v21 = vpop.f32.mrf.mxu0 }
  0xbb   :  { %363 = vst.msk [vmem:[#allocation2] sm:$0xff] %vm51_vm0, %v359_v12  ;;  %v263_v14 = vadd.f32 %v262_v13, %v220_v11 }
  0xbd   :  { %v224_v15 = vpop.f32.mrf.mxu2  ;;  %v312_v16 = vadd.f32 %v311_v7, %v263_v14  ;;  %v352_v25 = vpop.f32.mrf.mxu1 }
  0xbe   :  { %v225_v22 = vadd.f32 %v224_v15, %v181_v18 }
  0xbf   :  { %v349_v19 = vadd.f32 %v348_v10, %v312_v16 }
  0xc1   :  { %v360_v23 = vadd.f32 %v349_v19, %v57_v17 }
  0xc2   :  { %v268_v24 = vpop.f32.mrf.mxu3  ;;  %v370_v26 = vld [vmem:[#allocation2] sm:$0xff]  ;;  %v319_v37 = vpop.f32.mrf.mxu0 }
  0xc3   :  { %364 = vst.msk [vmem:[#allocation2 + $0x8] sm:$0xff] %vm51_vm0, %v360_v23  ;;  %v269_v27 = vadd.f32 %v268_v24, %v225_v22  ;;  %v378_v28 = vadd.f32 %v420_v20, %v370_v26 }
  0xc5   :  { %v316_v29 = vadd.f32 %v315_v21, %v269_v27  ;;  %382 = vst.msk [vmem:[#allocation8] sm:$0xff] %vm51_vm0, %v378_v28  ;;  %v229_v30 = vpop.f32.mrf.mxu2  ;;  %v356_v41 = vpop.f32.mrf.mxu1 }
  0xc6   :  { %v230_v34 = vadd.f32 %v229_v30, %v185_v32 }
  0xc7   :  { %v353_v33 = vadd.f32 %v352_v25, %v316_v29 }
  0xc9   :  { %v361_v35 = vadd.f32 %v353_v33, %v58_v31 }
  0xca   :  { %v274_v36 = vpop.f32.mrf.mxu3  ;;  %v371_v38 = vld [vmem:[#allocation2 + $0x8] sm:$0xff] }
  0xcb   :  { %365 = vst.msk [vmem:[#allocation2 + $0x10] sm:$0xff] %vm51_vm0, %v361_v35  ;;  %v275_v39 = vadd.f32 %v274_v36, %v230_v34  ;;  %v379_v40 = vadd.f32 %v420_v20, %v371_v38 }
  0xcd   :  { %v320_v42 = vadd.f32 %v319_v37, %v275_v39  ;;  %383 = vst.msk [vmem:[#allocation8 + $0x8] sm:$0xff] %vm51_vm0, %v379_v40 }
  0xcf   :  { %v357_v44 = vadd.f32 %v356_v41, %v320_v42 }
  0xd1   :  { %v362_v45 = vadd.f32 %v357_v44, %v59_v43 }
  0xd2   :  { %v372_v46 = vld [vmem:[#allocation2 + $0x10] sm:$0xff] }
  0xd3   :  { %366 = vst.msk [vmem:[#allocation2 + $0x18] sm:$0xff] %vm51_vm0, %v362_v45  ;;  %v380_v47 = vadd.f32 %v420_v20, %v372_v46 }
  0xd5   :  { %384 = vst.msk [vmem:[#allocation8 + $0x10] sm:$0xff] %vm51_vm0, %v380_v47 }
  0xda   :  { %v373_v48 = vld [vmem:[#allocation2 + $0x18] sm:$0xff] }
  0xdb   :  { %v381_v49 = vadd.f32 %v420_v20, %v373_v48 }
  0xdd   :  { %385 = vst.msk [vmem:[#allocation8 + $0x18] sm:$0xff] %vm51_vm0, %v381_v49 }
  0xde   :  { %398 = dma.vmem_to_hbm [thread:$0]  %s391_s24, 512, %s393_s27, [#allocation5], %s500_s20, %s500_s20, %s501_s21  }
  0xdf   :  { %497 = dma.done.wait [#allocation5], 512  }
  0xe0   :  { %498 = vsyncadd [#allocation5], 4294966784 }
  0xe1   :  { %403 = vsyncpa [#allocation4], 1 }
  0xe2   :  { %404 = vsyncpa [#allocation7], 1 }
  0xe3   :  { %405 = vsyncpa [#allocation5], 1 }

</bundles_post_ra>
